<compile_context>
chip_gen: v7x
topology: tpu7x:2x2x1
jax: 0.10.0
libtpu: 0.0.40
codegen_flags: <defaults>
</compile_context>

<pallas_src>
import functools

import jax
import jax.numpy as jnp
import numpy as np
from jax.experimental import pallas as pl
from jax.experimental.pallas import tpu as pltpu


def _round_up(x: int, m: int) -> int:
    return ((x + m - 1) // m) * m


def _choose_tile_rows(B: int, N: int) -> int:
    """Molecule-tile height (rows per grid step), sized by bytes.

    * >= ~3 MiB of real data per input stream per step when possible (amortizes
      the ~0.35us per-grid-step overhead),
    * double-buffered VMEM working set (with lane padding of the minor dim to
      128) kept under ~24 MiB (v7x: 64 MiB physical / 32 MiB scoped default),
    * >= 2 grid tiles for large batches so v7x's two TensorCores both get work.
    """
    if B <= 8:
        return B  # block row-dim == full array dim (allowed by layout rules)
    lanes = _round_up(N, 128)                      # VMEM minor-dim lane padding
    vmem_per_row = 4 * (3 * lanes + 128)           # e, s, q tiles + fused aux row
    cap = max(8, (24 << 20) // (2 * vmem_per_row))  # 2 = double buffering
    target = max(512, (3 << 20) // max(4 * N, 1))   # ~3 MiB of real data / stream
    tb = max(8, min(target, cap))
    tb = min(tb, max(8, _round_up(pl.cdiv(B, 2), 8)))  # keep >= 2 tiles (megacore)
    tb = min(tb, _round_up(B, 8))
    return _round_up(tb, 8)


def _charge_equilibrium_kernel(aux_ref, e_ref, s_ref, q_out_ref, *, num_rows):
    """One molecule tile in the caller's native [molecules, atoms] layout.

    aux_ref   : [tb, 2] f32 -- col 0: per-molecule atom count, col 1: sum_q
    e_ref     : [tb, N] f32 -- electronegativity
    s_ref     : [tb, N] f32 -- hardness
    q_out_ref : [tb, N] f32 -- output charges
    """
    e = e_ref[...]
    s = s_ref[...]
    aux = aux_ref[...]

    tb, n = e.shape
    n_atoms = aux[:, 0:1].astype(jnp.int32)   # [tb, 1] real-atom count / molecule
    sum_q = aux[:, 1:2]                       # [tb, 1] per-molecule total charge

    # Validity mask built in-kernel: atom index within the molecule's count AND
    # row within the real batch (the last grid tile may run past B; those rows
    # read unspecified data and their writes are dropped, but we still mask so
    # no inf/NaN is ever produced).
    col = jax.lax.broadcasted_iota(jnp.int32, (tb, n), 1)
    row = jax.lax.broadcasted_iota(jnp.int32, (tb, n), 0) + pl.program_id(0) * tb
    valid = (col < n_atoms) & (row < num_rows)

    # Exact reciprocal (divide): memory-bound kernel, the VALU/EUP work is free
    # under the DMAs and keeps ~1e-6 accuracy.  Exactly 0 in padded slots.
    s_inv = jnp.where(valid, 1.0 / jnp.where(valid, s, 1.0), 0.0)
    e_s_inv = jnp.where(valid, e, 0.0) * s_inv

    # Per-molecule reductions over the atom (lane) axis == DGL n1_in_g sums.
    sum_s_inv = jnp.sum(s_inv, axis=1, keepdims=True)      # [tb, 1]
    sum_e_s_inv = jnp.sum(e_s_inv, axis=1, keepdims=True)  # [tb, 1]

    # Lagrange multiplier; guard the denominator *before* the divide so padded
    # molecules never see inf/NaN anywhere (not even pre-select).
    ok = sum_s_inv > 0.0
    lam = jnp.where(ok, (sum_q + sum_e_s_inv) / jnp.where(ok, sum_s_inv, 1.0), 0.0)

    # q_i = -e_i/s_i + (1/s_i) * lam ; already exactly 0 in padded atom slots.
    q_out_ref[...] = s_inv * lam - e_s_inv


def charge_equilibrium(e, s, n_atoms, total_charge=0.0, q_ref=None, tile_rows=None):
    """Pallas-backed forward of ChargeEquilibrium.

    e, s    : [B, N] per-atom electronegativity / hardness (dense padded batch,
              native [molecules, atoms] layout; no transposes are performed).
    n_atoms : [B] number of real atoms per molecule (rest of each row = padding).
    total_charge : scalar (python or traced), used when q_ref is None.
    q_ref   : optional [B, N] per-atom reference charges (sum_q = masked sum).
    tile_rows : optional override of the molecule-tile height.

    Returns q : [B, N] float32, exactly 0 in padded atom slots, with
    sum_i q[b, i] == sum_q[b] up to f32 rounding.
    """
    B, N = e.shape
    e = e.astype(jnp.float32)
    s = s.astype(jnp.float32)
    n_atoms = jnp.asarray(n_atoms, jnp.int32).reshape(B)

    # Per-molecule sum_q is a [B] vector computed in plain JAX (tiny), so the
    # kernel never streams an all-zeros / reference-charge [B, N] array.
    if q_ref is None:
        sum_q = jnp.broadcast_to(jnp.asarray(total_charge, jnp.float32), (B,))
    else:
        valid = jnp.arange(N, dtype=jnp.int32)[None, :] < n_atoms[:, None]
        sum_q = jnp.sum(jnp.where(valid, q_ref.astype(jnp.float32), 0.0), axis=1)

    # Fuse the two per-molecule scalars into a single [B, 2] stream (one DMA
    # descriptor per grid step instead of two).
    aux = jnp.stack([n_atoms.astype(jnp.float32), sum_q], axis=1)

    tb = int(tile_rows) if tile_rows is not None else _choose_tile_rows(B, N)
    grid = (pl.cdiv(B, tb),)

    # Explicit scoped-VMEM limit so multi-MiB tiles also compile on v5e
    # (16 MiB scoped default); account for (8,128) lane padding of the minor dim.
    lanes = _round_up(N, 128)
    ws_bytes = 2 * tb * 4 * (3 * lanes + 128)
    vmem_limit = int(min(40 << 20, max(16 << 20, ws_bytes + (4 << 20))))

    def row_spec(cols):
        return pl.BlockSpec((tb, cols), lambda i: (i, 0))

    return pl.pallas_call(
        functools.partial(_charge_equilibrium_kernel, num_rows=B),
        out_shape=jax.ShapeDtypeStruct((B, N), jnp.float32),
        grid=grid,
        in_specs=[row_spec(2), row_spec(N), row_spec(N)],
        out_specs=row_spec(N),
        compiler_params=pltpu.CompilerParams(
            dimension_semantics=("parallel",),   # molecules are independent
            vmem_limit_bytes=vmem_limit,
        ),
    )(aux, e, s)


def reference(e, s, mask, sum_q):
    """Pure-JAX exact reference (same masked math, exact reciprocals)."""
    s_inv = mask / s
    e_s_inv = e * s_inv
    sum_s_inv = jnp.sum(s_inv, axis=1, keepdims=True)
    sum_e_s_inv = jnp.sum(e_s_inv, axis=1, keepdims=True)
    return s_inv * (sum_q + sum_e_s_inv) / sum_s_inv - e_s_inv


if __name__ == "__main__":
    key = jax.random.PRNGKey(0)
    k1, k2, k3, k4, k5, k6 = jax.random.split(key, 6)

    # ---------- Test 1: small batch, total_charge branch (no q_ref) ----------
    B, N = 4, 16
    e = jax.random.normal(k1, (B, N), dtype=jnp.float32)
    s = jax.nn.softplus(jax.random.normal(k2, (B, N), dtype=jnp.float32)) + 0.5
    n_atoms = jnp.array([16, 10, 7, 12], dtype=jnp.int32)
    total_charge = 1.0

    q = jax.block_until_ready(
        charge_equilibrium(e, s, n_atoms, total_charge=total_charge))

    mask = (jnp.arange(N)[None, :] < n_atoms[:, None]).astype(jnp.float32)
    q_exp = reference(e, s, mask, jnp.full((B, 1), total_charge, jnp.float32))
    assert np.allclose(np.asarray(q), np.asarray(q_exp), rtol=1e-5, atol=1e-5)
    # Per-molecule charge conservation (exact up to f32 rounding).
    assert np.allclose(np.asarray(jnp.sum(q, axis=1)), total_charge, atol=1e-4)
    assert np.all(np.asarray(q)[np.asarray(mask) == 0.0] == 0.0)

    # ---------- Test 2: q_ref branch, multi-tile grid, ragged last tile ----------
    B2, N2 = 300, 24
    e2 = jax.random.normal(k3, (B2, N2), dtype=jnp.float32)
    s2 = jax.nn.softplus(jax.random.normal(k4, (B2, N2), dtype=jnp.float32)) + 0.5
    n_atoms2 = jax.random.randint(k5, (B2,), 1, N2 + 1).astype(jnp.int32)
    q_ref2 = 0.1 * jax.random.normal(k6, (B2, N2), dtype=jnp.float32)
    mask2 = (jnp.arange(N2)[None, :] < n_atoms2[:, None]).astype(jnp.float32)

    q2 = jax.block_until_ready(
        charge_equilibrium(e2, s2, n_atoms2, q_ref=q_ref2))

    sum_q2 = jnp.sum(mask2 * q_ref2, axis=1, keepdims=True)
    q2_exp = reference(e2, s2, mask2, sum_q2)
    assert np.allclose(np.asarray(q2), np.asarray(q2_exp), rtol=1e-5, atol=1e-5)
    assert np.allclose(np.asarray(jnp.sum(q2, axis=1)),
                       np.asarray(sum_q2[:, 0]), atol=1e-4)
    assert np.all(np.asarray(q2)[np.asarray(mask2) == 0.0] == 0.0)

    # ---------- Test 3: explicit small tile -> longer grid + OOB rows ----------
    q3 = jax.block_until_ready(
        charge_equilibrium(e2, s2, n_atoms2, q_ref=q_ref2, tile_rows=64))
    assert np.allclose(np.asarray(q3), np.asarray(q2_exp), rtol=1e-5, atol=1e-5)

    print("KERNEL_OK")
</pallas_src>

<mosaic_0001>
module attributes {stable_mosaic.version = 11 : i64} {
  func.func @_charge_equilibrium_kernel(%arg0: i32, %arg1: memref<4x2xf32, #tpu.memory_space<vmem>>, %arg2: memref<4x16xf32, #tpu.memory_space<vmem>>, %arg3: memref<4x16xf32, #tpu.memory_space<vmem>>, %arg4: memref<4x16xf32, #tpu.memory_space<vmem>>) attributes {dimension_semantics = [#tpu.dimension_semantics<parallel>], iteration_bounds = array<i64: 1>, scalar_prefetch = 0 : i64, scratch_operands = 0 : i64, tpu.core_type = #tpu.core_type<tc>, window_params = [{transform_indices = @transform_0, window_bounds = array<i64: 4, 2>}, {transform_indices = @transform_1, window_bounds = array<i64: 4, 16>}, {transform_indices = @transform_2, window_bounds = array<i64: 4, 16>}, {transform_indices = @transform_3, window_bounds = array<i64: 4, 16>}]} {
    %c0 = arith.constant 0 : index
    %c0_0 = arith.constant 0 : index
    %0 = vector.load %arg2[%c0, %c0_0] : memref<4x16xf32, #tpu.memory_space<vmem>>, vector<4x16xf32>
    %c0_1 = arith.constant 0 : index
    %c0_2 = arith.constant 0 : index
    %1 = vector.load %arg3[%c0_1, %c0_2] : memref<4x16xf32, #tpu.memory_space<vmem>>, vector<4x16xf32>
    %c0_3 = arith.constant 0 : index
    %c0_4 = arith.constant 0 : index
    %2 = vector.load %arg1[%c0_3, %c0_4] : memref<4x2xf32, #tpu.memory_space<vmem>>, vector<4x2xf32>
    %3 = vector.extract_strided_slice %2 {offsets = [0, 0], sizes = [4, 1], strides = [1, 1]} : vector<4x2xf32> to vector<4x1xf32>
    %4 = arith.fptosi %3 : vector<4x1xf32> to vector<4x1xi32>
    %5 = vector.extract_strided_slice %2 {offsets = [0, 1], sizes = [4, 1], strides = [1, 1]} : vector<4x2xf32> to vector<4x1xf32>
    %6 = tpu.iota {dimensions = array<i32: 1>} : vector<4x16xi32>
    %7 = tpu.iota {dimensions = array<i32: 0>} : vector<4x16xi32>
    %c4_i32 = arith.constant 4 : i32
    %8 = arith.muli %arg0, %c4_i32 : i32
    %9 = vector.broadcast %8 : i32 to vector<4x16xi32>
    %10 = arith.addi %7, %9 : vector<4x16xi32>
    %11 = vector.broadcast %4 : vector<4x1xi32> to vector<4x16xi32>
    %12 = arith.cmpi slt, %6, %11 : vector<4x16xi32>
    %c4_i32_5 = arith.constant 4 : i32
    %13 = vector.broadcast %c4_i32_5 : i32 to vector<4x16xi32>
    %14 = arith.cmpi slt, %10, %13 : vector<4x16xi32>
    %15 = arith.andi %12, %14 : vector<4x16xi1>
    %cst = arith.constant 1.000000e+00 : f32
    %16 = vector.broadcast %cst : f32 to vector<4x16xf32>
    %17 = arith.select %15, %1, %16 : vector<4x16xi1>, vector<4x16xf32>
    %cst_6 = arith.constant 1.000000e+00 : f32
    %18 = vector.broadcast %cst_6 : f32 to vector<4x16xf32>
    %19 = arith.divf %18, %17 : vector<4x16xf32>
    %cst_7 = arith.constant 0.000000e+00 : f32
    %20 = vector.broadcast %cst_7 : f32 to vector<4x16xf32>
    %21 = arith.select %15, %19, %20 : vector<4x16xi1>, vector<4x16xf32>
    %cst_8 = arith.constant 0.000000e+00 : f32
    %22 = vector.broadcast %cst_8 : f32 to vector<4x16xf32>
    %23 = arith.select %15, %0, %22 : vector<4x16xi1>, vector<4x16xf32>
    %24 = arith.mulf %23, %21 : vector<4x16xf32>
    %cst_9 = arith.constant dense<0.000000e+00> : vector<4xf32>
    %25 = vector.multi_reduction <add>, %21, %cst_9 [1] : vector<4x16xf32> to vector<4xf32>
    %26 = vector.shape_cast %25 : vector<4xf32> to vector<4x1xf32>
    %cst_10 = arith.constant dense<0.000000e+00> : vector<4xf32>
    %27 = vector.multi_reduction <add>, %24, %cst_10 [1] : vector<4x16xf32> to vector<4xf32>
    %28 = vector.shape_cast %27 : vector<4xf32> to vector<4x1xf32>
    %cst_11 = arith.constant 0.000000e+00 : f32
    %29 = vector.broadcast %cst_11 : f32 to vector<4x1xf32>
    %30 = arith.cmpf ogt, %26, %29 : vector<4x1xf32>
    %31 = arith.addf %5, %28 : vector<4x1xf32>
    %cst_12 = arith.constant 1.000000e+00 : f32
    %32 = vector.broadcast %cst_12 : f32 to vector<4x1xf32>
    %33 = arith.select %30, %26, %32 : vector<4x1xi1>, vector<4x1xf32>
    %34 = arith.divf %31, %33 : vector<4x1xf32>
    %cst_13 = arith.constant 0.000000e+00 : f32
    %35 = vector.broadcast %cst_13 : f32 to vector<4x1xf32>
    %36 = arith.select %30, %34, %35 : vector<4x1xi1>, vector<4x1xf32>
    %37 = vector.broadcast %36 : vector<4x1xf32> to vector<4x16xf32>
    %38 = arith.mulf %21, %37 : vector<4x16xf32>
    %39 = arith.subf %38, %24 : vector<4x16xf32>
    %c0_14 = arith.constant 0 : index
    %c0_15 = arith.constant 0 : index
    %40 = vector.load %arg4[%c0_14, %c0_15] : memref<4x16xf32, #tpu.memory_space<vmem>>, vector<4x16xf32>
    tpu.vector_store %arg4[%c0_14, %c0_15], %39 {strides = array<i32>} : memref<4x16xf32, #tpu.memory_space<vmem>>, vector<4x16xf32>,
    return
  }
  func.func @transform_0(%arg0: i32) -> (i32, i32) {
    %c0_i32 = arith.constant 0 : i32
    %c0_i32_0 = arith.constant 0 : i32
    return %arg0, %c0_i32 : i32, i32
  }
  func.func @transform_1(%arg0: i32) -> (i32, i32) {
    %c0_i32 = arith.constant 0 : i32
    %c0_i32_0 = arith.constant 0 : i32
    return %arg0, %c0_i32 : i32, i32
  }
  func.func @transform_2(%arg0: i32) -> (i32, i32) {
    %c0_i32 = arith.constant 0 : i32
    %c0_i32_0 = arith.constant 0 : i32
    return %arg0, %c0_i32 : i32, i32
  }
  func.func @transform_3(%arg0: i32) -> (i32, i32) {
    %c0_i32 = arith.constant 0 : i32
    %c0_i32_0 = arith.constant 0 : i32
    return %arg0, %c0_i32 : i32, i32
  }
}

</mosaic_0001>

<bundles_post_ra>
// kernel: tpu_custom_call.1
= control target key start
LH: loop header
LB: loop body
LE: loop exit
PB: predicated region body
PF: predicated region fallthrough
CT: control target
= control target key end

     0   :  { %s156_s0 = inlined_call_operand.vmem [shape: f32[4,2], index: 0, kind: input, shape index: {}]   ;;  %s157_s1 = inlined_call_operand.vmem [shape: f32[4,16], index: 1, kind: input, shape index: {}]   ;;  %s158_s2 = inlined_call_operand.vmem [shape: f32[4,16], index: 2, kind: input, shape index: {}]   ;;  %s159_s3 = inlined_call_operand.hbm [shape: f32[4,16], index: 3, kind: output, shape index: {}]  }
   0x1   :  { %v17_v0 = vld [vmem:[%s156_s0] sm:$0xf] }
   0x2   :  { %8 = vsyncpa [#allocation3], 0  ;;  %v109_v1 = vmov 0   ;;  %v73_v2 = vtrunc.f32 %v17_v0  ;;  %v19_v4 = vlaneseq  ;;  %v16_v8 = vld [vmem:[%s158_s2] sm:$0xf]  ;;  %vm38_vm3 = vcmask 125952  }
   0x3   :  { %78 = vset.pattern.permute.xlu0 %v109_v1  ;;  %v15_v10 = vld [vmem:[%s157_s1] sm:$0xf]  ;;  %v110_v17 = vmov 1   ;;  %s111_s1 = smov [#allocation2]  }
   0x4   :  { %v74_v3 = vcvt.f32.s32 %v73_v2  ;;  %v22_v5 = vshrl.u32 %v19_v4, 7  ;;  %v20_v6 = vand.u32 127, %v19_v4  ;;  %79 = vset.pattern.permute.xlu1 %v110_v17  ;;  %s65_s2 = sshll.u32 %s111_s1, 4  ;;  %s66_s2 = int_to_ptr.vmem [resolvable:$true] %s65_s2 }
   0x5   :  { %s85_s17 = scalar_lea.vmem %s66_s2, 64  ;;  %p90_p1 = scmp.lt.s32.totalorder %s66_s2, %s66_s2 }
   0x6   :  { %27 = vperm.xlu0 %78, %v74_v3   ;;  %vm30_vm0 = vcmp.lt.s32.totalorder %v22_v5, 4  ;;  %p86_p0 = scmp.ne.s32.totalorder %s66_s2, %s85_s17  ;;  %p91_p2 = scmp.lt.s32.totalorder %s85_s17, %s85_s17 }
   0x8   :  { %p92_p3 = por %p91_p2, %p90_p1 }
   0xa   :  { %80 = vset.pattern.permute.xlu0 %v110_v17  ;;  %p93_p4 = pnand %p92_p3, %p86_p0 }
  0x85   :  { %v28_v7 = vpop.permute.xlu0 %27 }
  0x86   :  { %vm29_vm1 = vcmp.lt.s32.totalorder %v20_v6, %v28_v7 }
  0x87   :  { %vm31_vm2 = vmand %vm29_vm1, %vm30_vm0 }
  0x88   :  { %v32_v9 = vsel %vm31_vm2, %v16_v8, 1.0  ;;  %v36_v13 = vsel %vm31_vm2, %v15_v10, 0.0 }
  0x89   :  { %81 = vrcp.f32 %v32_v9 }
  0x93   :  { %v82_v11 = vpop.eup %81 }
  0x94   :  { %v35_v12 = vsel %vm31_vm2, %v82_v11, 0.0 }
  0x95   :  { %v39_v14 = vsel %vm38_vm3, %v35_v12, 0.0  ;;  %v37_v15 = vmul.f32 %v36_v13, %v35_v12 }
  0x96   :  { %40 = vadd.xlane.f32.xlu0 %v39_v14 }
  0x97   :  { %v42_v16 = vsel %vm38_vm3, %v37_v15, 0.0 }
  0x98   :  { %43 = vadd.xlane.f32.xlu1 %v42_v16 }
 0x123   :  { %v41_v18 = vpop.xlane.xlu0 %40 }
 0x124   :  { %vm45_vm4 = vcmp.gt.f32.partialorder %v41_v18, 0.0 }
 0x125   :  { %v47_v19 = vsel %vm45_vm4, %v41_v18, 1.0  ;;  %v44_v20 = vpop.xlane.xlu1 %43 }
 0x126   :  { %83 = vrcp.f32 %v47_v19  ;;  %v46_v21 = vadd.f32 %v44_v20, %v17_v0 }
 0x130   :  { %v84_v22 = vpop.eup %83 }
 0x131   :  { %v49_v23 = vmul.f32 %v84_v22, %v46_v21 }
 0x133   :  { %v50_v24 = vsel %vm45_vm4, %v49_v23, 0.0 }
 0x134   :  { %53 = vperm.xlu1 %79, %v50_v24  }
 0x1b3   :  { %v54_v25 = vpop.permute.xlu1 %53 }
 0x1b4   :  { %v56_v26 = vmul.f32 %v54_v25, %v35_v12 }
 0x1b6   :  { %v57_v27 = vsub.f32 %v56_v26, %v37_v15 }
 0x1b8   :  { %58 = vst.msk [vmem:[#allocation2] sm:$0xf] %vm38_vm3, %v57_v27 }
 0x1b9   :  { %96 = shalt.err (!%p93_p4)
}
 0x1ba   :  { %s97_s20 = scalar_lea.hbm %s159_s3, 64 }
 0x1bb   :  { %p98_p5 = scmp.ne.s32.totalorder %s159_s3, %s97_s20  ;;  %p101_p6 = scmp.lt.u32.totalorder %s97_s20, %s159_s3 }
 0x1bd   :  { %p103_p7 = pnand %p101_p6, %p98_p5 }
 0x1bf   :  { %106 = shalt.err (!%p103_p7)
}
 0x1c0   :  { %68 = dma.vmem_to_hbm [thread:$0]  %s66_s2, 64, %s159_s3, [#allocation3]  }
 0x1c1   :  { %107 = dma.done.wait [#allocation3], 64  }
 0x1c2   :  { %108 = vsyncadd [#allocation3], 4294967232 }
 0x1c3   :  { %72 = vsyncpa [#allocation3], 1 }

</bundles_post_ra>
